<compile_context>
chip_gen: v5e
topology: v5e:2x2
jax: 0.10.0
libtpu: 0.0.40
codegen_flags: <defaults>
</compile_context>

<pallas_src>
import jax
import jax.numpy as jnp
from jax.experimental import pallas as pl
from jax.experimental.pallas import tpu as pltpu


def _ru(n: int, m: int) -> int:
    """Round n up to a multiple of m."""
    return (n + m - 1) // m * m


def _ru8(n: int) -> int:
    return _ru(n, 8)


# ----------------------------------------------------------------------------
# Kernel
# ----------------------------------------------------------------------------
def critic_kernel(x_ref, a_ref, wp_ref, aux_ref, o_ref):
    d8 = x_ref.shape[1]           # padded input_size
    a8 = a_ref.shape[1]           # padded num_actions
    h8 = wp_ref.shape[1]          # padded hidden_size
    cdt = wp_ref.dtype            # matmul operand dtype (f32 or bf16)

    x = x_ref[...]                # [TB, d8]
    a = a_ref[...]                # [TB, a8]

    # 8-aligned static slices into the packed weight buffer (no copies).
    w1 = wp_ref[0:d8, :]                       # [d8, h8]
    w2x = wp_ref[d8:d8 + h8, :]                # [h8, h8]
    w2a = wp_ref[d8 + h8:d8 + h8 + a8, :]      # [a8, h8]

    aux = aux_ref[...]                         # [4, h8] f32
    b1 = aux[0:1, :]
    b2 = aux[1:2, :]
    w3r = aux[2:3, :]
    b3 = aux[3:4, 0:1]

    # fc1 + relu (MXU matmul, f32 accumulate; bias/relu in f32).
    h1 = jnp.dot(x, w1, preferred_element_type=jnp.float32) + b1
    h1 = jnp.maximum(h1, 0.0)                  # [TB, h8], pad cols stay 0

    # fc2: concat expressed as split matmul, + relu.
    h2 = (jnp.dot(h1.astype(cdt), w2x, preferred_element_type=jnp.float32)
          + jnp.dot(a, w2a, preferred_element_type=jnp.float32)
          + b2)
    h2 = jnp.maximum(h2, 0.0)                  # [TB, h8]

    # fc3: single output column -> VPU multiply + XLU lane reduction.
    o_ref[...] = jnp.sum(h2 * w3r, axis=-1, keepdims=True) + b3   # [TB, 1]


# ----------------------------------------------------------------------------
# One-time parameter packing
# ----------------------------------------------------------------------------
def prepare_params(params, use_bf16=False):
    """Lay out nn.Linear-style params (W:[out,in], b:[out]) into the two packed
    kernel buffers. Call once, outside the hot path."""
    w1, b1, w2, b2, w3, b3 = (params["w1"], params["b1"], params["w2"],
                              params["b2"], params["w3"], params["b3"])
    H, D = w1.shape
    A = w2.shape[1] - H
    d8, h8, a8 = _ru8(D), _ru8(H), _ru8(A)
    cdt = jnp.bfloat16 if use_bf16 else jnp.float32

    wpack = jnp.zeros((d8 + h8 + a8, h8), cdt)
    wpack = wpack.at[0:D, 0:H].set(w1.T.astype(cdt))                     # W1^T
    wpack = wpack.at[d8:d8 + H, 0:H].set(w2[:, :H].T.astype(cdt))        # W2_state^T
    wpack = wpack.at[d8 + h8:d8 + h8 + A, 0:H].set(w2[:, H:].T.astype(cdt))  # W2_action^T

    aux = jnp.zeros((4, h8), jnp.float32)
    aux = aux.at[0, 0:H].set(b1)
    aux = aux.at[1, 0:H].set(b2)
    aux = aux.at[2, 0:H].set(w3[0])            # W3 row
    aux = aux.at[3, :].set(b3[0])              # b3 broadcast across the row
    return {"wpack": wpack, "aux": aux, "dims": (D, A, H)}


# ----------------------------------------------------------------------------
# Wrapper
# ----------------------------------------------------------------------------
def critic_forward(x, a, prepared, *, block_b=1024):
    """x: [B, input_size], a: [B, num_actions] -> q: [B, 1] (f32)."""
    wpack, aux = prepared["wpack"], prepared["aux"]
    D, A, H = prepared["dims"]
    B = x.shape[0]
    d8, a8, h8 = _ru8(D), _ru8(A), _ru8(H)
    R = wpack.shape[0]
    cdt = wpack.dtype
    itemsize = jnp.dtype(cdt).itemsize
    align = 16 if itemsize == 2 else 8         # bf16 packs sublanes in pairs

    # ----- tile-size selection from a per-generation-safe VMEM budget -------
    fixed = R * h8 * itemsize + 4 * h8 * 4                 # weights, single-buffered
    per_row = (2 * (d8 + a8) * itemsize                    # x/a tiles (double-buffered)
               + 2 * h8 * 4                                # h1/h2 intermediates (f32)
               + 2 * 128 * 4)                              # output tile, lane-padded
    budget = 40 << 20                                      # below v7x 64 MiB physical
    tb_cap = max(align, (budget - fixed) // per_row // align * align)
    TB = min(_ru(block_b, align), tb_cap, 2048, _ru(B, align))
    if B >= 64:
        # v7x: guarantee >= 2 grid steps so ("parallel",) uses both TensorCores.
        TB = min(TB, _ru((B + 1) // 2, align))
    TB = max(TB, align)

    Bp = _ru(B, TB)
    grid = (Bp // TB,)

    # Cast to matmul-operand dtype and zero-pad batch/feature dims once.
    x = jnp.pad(x.astype(cdt), ((0, Bp - B), (0, d8 - D)))
    a = jnp.pad(a.astype(cdt), ((0, Bp - B), (0, a8 - A)))

    # Explicit VMEM limit: estimated footprint + headroom, capped for v7x.
    vmem_limit = int(min(48 << 20, max(16 << 20, fixed + TB * per_row + (4 << 20))))

    out = pl.pallas_call(
        critic_kernel,
        out_shape=jax.ShapeDtypeStruct((Bp, 1), jnp.float32),
        grid=grid,
        in_specs=[
            pl.BlockSpec((TB, d8), lambda i: (i, 0)),                 # x tile
            pl.BlockSpec((TB, a8), lambda i: (i, 0)),                 # a tile
            pl.BlockSpec((R, h8), lambda i: (0, 0),
                         pipeline_mode=pl.Buffered(1)),               # packed weights
            pl.BlockSpec((4, h8), lambda i: (0, 0),
                         pipeline_mode=pl.Buffered(1)),               # biases + W3 row
        ],
        out_specs=pl.BlockSpec((TB, 1), lambda i: (i, 0)),
        compiler_params=pltpu.CompilerParams(
            dimension_semantics=("parallel",),
            vmem_limit_bytes=vmem_limit),
    )(x, a, wpack, aux)

    return out[:B]


# ----------------------------------------------------------------------------
# Reference init / forward (for testing)
# ----------------------------------------------------------------------------
def init_params(key, input_size, hidden_size, num_actions):
    """Deterministic init mirroring nn.Linear shapes (W: [out, in], b: [out])."""
    ks = jax.random.split(key, 6)

    def lin(kw, kb, fan_in, fan_out):
        bound = 1.0 / jnp.sqrt(fan_in)
        w = jax.random.uniform(kw, (fan_out, fan_in), jnp.float32, -bound, bound)
        b = jax.random.uniform(kb, (fan_out,), jnp.float32, -bound, bound)
        return w, b

    w1, b1 = lin(ks[0], ks[1], input_size, hidden_size)
    w2, b2 = lin(ks[2], ks[3], hidden_size + num_actions, hidden_size)
    w3, b3 = lin(ks[4], ks[5], hidden_size, 1)
    return {"w1": w1, "b1": b1, "w2": w2, "b2": b2, "w3": w3, "b3": b3}


def critic_reference(x, a, p):
    h1 = jnp.maximum(x @ p["w1"].T + p["b1"], 0.0)
    h2 = jnp.maximum(jnp.concatenate([h1, a], axis=1) @ p["w2"].T + p["b2"], 0.0)
    return h2 @ p["w3"].T + p["b3"]


if __name__ == "__main__":
    key = jax.random.PRNGKey(0)
    k_x, k_a, k_p, k_x2, k_a2 = jax.random.split(key, 5)

    batch, input_size, hidden_size, num_actions = 8, 16, 32, 8

    x = jax.random.normal(k_x, (batch, input_size), jnp.float32)
    a = jax.random.normal(k_a, (batch, num_actions), jnp.float32)
    params = init_params(k_p, input_size, hidden_size, num_actions)
    q_ref = critic_reference(x, a, params)

    # --- f32 path (single grid step) ---
    prep_f32 = prepare_params(params, use_bf16=False)
    q = jax.block_until_ready(critic_forward(x, a, prep_f32))
    assert q.shape == (batch, 1)
    assert jnp.allclose(q, q_ref, atol=1e-5, rtol=1e-5), "f32 mismatch vs reference"

    # --- multi-step grid + ragged batch padding path ---
    batch2 = 200
    x2 = jax.random.normal(k_x2, (batch2, input_size), jnp.float32)
    a2 = jax.random.normal(k_a2, (batch2, num_actions), jnp.float32)
    q2_ref = critic_reference(x2, a2, params)
    q2 = jax.block_until_ready(critic_forward(x2, a2, prep_f32, block_b=64))
    assert q2.shape == (batch2, 1)
    assert jnp.allclose(q2, q2_ref, atol=1e-4, rtol=1e-4), "grid/pad mismatch vs reference"

    # --- bf16 matmul-operand path (f32 accumulate; loose tolerance) ---
    prep_bf16 = prepare_params(params, use_bf16=True)
    q16 = jax.block_until_ready(critic_forward(x, a, prep_bf16))
    assert q16.shape == (batch, 1)
    assert jnp.allclose(q16, q_ref, atol=1e-1, rtol=1e-1), "bf16 mismatch vs reference"

    print("KERNEL_OK")
</pallas_src>

<mosaic_0001>
module attributes {stable_mosaic.version = 11 : i64} {
  func.func @critic_kernel(%arg0: i32, %arg1: memref<8x16xf32, #tpu.memory_space<vmem>>, %arg2: memref<8x8xf32, #tpu.memory_space<vmem>>, %arg3: memref<56x32xf32, #tpu.memory_space<vmem>>, %arg4: memref<4x32xf32, #tpu.memory_space<vmem>>, %arg5: memref<8x1xf32, #tpu.memory_space<vmem>>) attributes {dimension_semantics = [#tpu.dimension_semantics<parallel>], iteration_bounds = array<i64: 1>, scalar_prefetch = 0 : i64, scratch_operands = 0 : i64, tpu.core_type = #tpu.core_type<tc>, window_params = [{transform_indices = @transform_0, window_bounds = array<i64: 8, 16>}, {transform_indices = @transform_1, window_bounds = array<i64: 8, 8>}, {pipeline_mode = #tpu.pipeline_mode<synchronous>, transform_indices = @transform_2, window_bounds = array<i64: 56, 32>}, {pipeline_mode = #tpu.pipeline_mode<synchronous>, transform_indices = @transform_3, window_bounds = array<i64: 4, 32>}, {transform_indices = @transform_4, window_bounds = array<i64: 8, 1>}]} {
    %c0 = arith.constant 0 : index
    %c0_0 = arith.constant 0 : index
    %0 = vector.load %arg1[%c0, %c0_0] : memref<8x16xf32, #tpu.memory_space<vmem>>, vector<8x16xf32>
    %c0_1 = arith.constant 0 : index
    %c0_2 = arith.constant 0 : index
    %1 = vector.load %arg2[%c0_1, %c0_2] : memref<8x8xf32, #tpu.memory_space<vmem>>, vector<8x8xf32>
    %c0_3 = arith.constant 0 : index
    %c0_4 = arith.constant 0 : index
    %2 = vector.load %arg3[%c0_3, %c0_4] : memref<56x32xf32, #tpu.memory_space<vmem>>, vector<16x32xf32>
    %c16 = arith.constant 16 : index
    %c0_5 = arith.constant 0 : index
    %3 = vector.load %arg3[%c16, %c0_5] : memref<56x32xf32, #tpu.memory_space<vmem>>, vector<32x32xf32>
    %c48 = arith.constant 48 : index
    %c0_6 = arith.constant 0 : index
    %4 = vector.load %arg3[%c48, %c0_6] : memref<56x32xf32, #tpu.memory_space<vmem>>, vector<8x32xf32>
    %c0_7 = arith.constant 0 : index
    %c0_8 = arith.constant 0 : index
    %5 = vector.load %arg4[%c0_7, %c0_8] : memref<4x32xf32, #tpu.memory_space<vmem>>, vector<4x32xf32>
    %6 = vector.extract_strided_slice %5 {offsets = [0, 0], sizes = [1, 32], strides = [1, 1]} : vector<4x32xf32> to vector<1x32xf32>
    %7 = vector.extract_strided_slice %5 {offsets = [1, 0], sizes = [1, 32], strides = [1, 1]} : vector<4x32xf32> to vector<1x32xf32>
    %8 = vector.extract_strided_slice %5 {offsets = [2, 0], sizes = [1, 32], strides = [1, 1]} : vector<4x32xf32> to vector<1x32xf32>
    %9 = vector.extract_strided_slice %5 {offsets = [3, 0], sizes = [1, 1], strides = [1, 1]} : vector<4x32xf32> to vector<1x1xf32>
    %cst = arith.constant dense<0.000000e+00> : vector<8x32xf32>
    %10 = tpu.matmul %0, %2, %cst {dimension_numbers = #tpu.dot_dimension_numbers<[1], [0], [0], [1], [0, 0, 1, 1], [], []>} : vector<8x16xf32>, vector<16x32xf32>, vector<8x32xf32> -> vector<8x32xf32>
    %11 = vector.broadcast %6 : vector<1x32xf32> to vector<8x32xf32>
    %12 = arith.addf %10, %11 : vector<8x32xf32>
    %cst_9 = arith.constant 0.000000e+00 : f32
    %13 = vector.broadcast %cst_9 : f32 to vector<8x32xf32>
    %14 = arith.maximumf %12, %13 : vector<8x32xf32>
    %cst_10 = arith.constant dense<0.000000e+00> : vector<8x32xf32>
    %15 = tpu.matmul %14, %3, %cst_10 {dimension_numbers = #tpu.dot_dimension_numbers<[1], [0], [0], [1], [0, 0, 1, 1], [], []>} : vector<8x32xf32>, vector<32x32xf32>, vector<8x32xf32> -> vector<8x32xf32>
    %cst_11 = arith.constant dense<0.000000e+00> : vector<8x32xf32>
    %16 = tpu.matmul %1, %4, %cst_11 {dimension_numbers = #tpu.dot_dimension_numbers<[1], [0], [0], [1], [0, 0, 1, 1], [], []>} : vector<8x8xf32>, vector<8x32xf32>, vector<8x32xf32> -> vector<8x32xf32>
    %17 = arith.addf %15, %16 : vector<8x32xf32>
    %18 = vector.broadcast %7 : vector<1x32xf32> to vector<8x32xf32>
    %19 = arith.addf %17, %18 : vector<8x32xf32>
    %cst_12 = arith.constant 0.000000e+00 : f32
    %20 = vector.broadcast %cst_12 : f32 to vector<8x32xf32>
    %21 = arith.maximumf %19, %20 : vector<8x32xf32>
    %22 = vector.broadcast %8 : vector<1x32xf32> to vector<8x32xf32>
    %23 = arith.mulf %21, %22 : vector<8x32xf32>
    %cst_13 = arith.constant dense<0.000000e+00> : vector<8xf32>
    %24 = vector.multi_reduction <add>, %23, %cst_13 [1] : vector<8x32xf32> to vector<8xf32>
    %25 = vector.shape_cast %24 : vector<8xf32> to vector<8x1xf32>
    %26 = vector.broadcast %9 : vector<1x1xf32> to vector<8x1xf32>
    %27 = arith.addf %25, %26 : vector<8x1xf32>
    %c0_14 = arith.constant 0 : index
    %c0_15 = arith.constant 0 : index
    %28 = vector.load %arg5[%c0_14, %c0_15] : memref<8x1xf32, #tpu.memory_space<vmem>>, vector<8x1xf32>
    tpu.vector_store %arg5[%c0_14, %c0_15], %27 {strides = array<i32>} : memref<8x1xf32, #tpu.memory_space<vmem>>, vector<8x1xf32>,
    return
  }
  func.func @transform_0(%arg0: i32) -> (i32, i32) {
    %c0_i32 = arith.constant 0 : i32
    %c0_i32_0 = arith.constant 0 : i32
    return %arg0, %c0_i32 : i32, i32
  }
  func.func @transform_1(%arg0: i32) -> (i32, i32) {
    %c0_i32 = arith.constant 0 : i32
    %c0_i32_0 = arith.constant 0 : i32
    return %arg0, %c0_i32 : i32, i32
  }
  func.func @transform_2(%arg0: i32) -> (i32, i32) {
    %c0_i32 = arith.constant 0 : i32
    %c0_i32_0 = arith.constant 0 : i32
    %c0_i32_1 = arith.constant 0 : i32
    return %c0_i32, %c0_i32_0 : i32, i32
  }
  func.func @transform_3(%arg0: i32) -> (i32, i32) {
    %c0_i32 = arith.constant 0 : i32
    %c0_i32_0 = arith.constant 0 : i32
    %c0_i32_1 = arith.constant 0 : i32
    return %c0_i32, %c0_i32_0 : i32, i32
  }
  func.func @transform_4(%arg0: i32) -> (i32, i32) {
    %c0_i32 = arith.constant 0 : i32
    %c0_i32_0 = arith.constant 0 : i32
    return %arg0, %c0_i32 : i32, i32
  }
}

</mosaic_0001>

<bundles_post_ra>
// kernel: tpu_custom_call.1
= control target key start
LH: loop header
LB: loop body
LE: loop exit
PB: predicated region body
PF: predicated region fallthrough
CT: control target
= control target key end

     0   :  { %vm28_vm0 = vcmask 130048   ;;  %vm53_vm1 = vcmask 64512   ;;  %vm77_vm2 = vcmask 261120   ;;  %vm111_vm3 = vcmask 7168   ;;  %s178_s2 = inlined_call_operand.vmem [shape: f32[56,32], index: 2, kind: input, shape index: {}]   ;;  %s179_s0 = inlined_call_operand.vmem [shape: f32[8,16], index: 0, kind: input, shape index: {}]   ;;  %s180_s1 = inlined_call_operand.vmem [shape: f32[8,8], index: 1, kind: input, shape index: {}]   ;;  %s181_s3 = inlined_call_operand.vmem [shape: f32[4,32], index: 3, kind: input, shape index: {}]   ;;  %s182_s4 = inlined_call_operand.vmem [shape: f32[8,1], index: 4, kind: output, shape index: {}]  }
   0x1   :  { %v20_v0 = vld [vmem:[%s178_s2 + $0x8] sm:$0xff]  ;;  %v19_v1 = vld [vmem:[%s178_s2] sm:$0xff]  ;;  %v22_v5 = vld [vmem:[%s178_s2 + $0x18] sm:$0xff] }
   0x2   :  { %46 = vmatpush.msra.mxu0 %v20_v0  ;;  %v17_v2 = vld [vmem:[%s179_s0] sm:$0xff]  ;;  %v24_v3 = vld [vmem:[%s178_s2 + $0x28] sm:$0xff]  ;;  %v21_v6 = vld [vmem:[%s178_s2 + $0x10] sm:$0xff] }
   0x3   :  { %93 = vmatpush.msra.mxu2 %v24_v3  ;;  %v23_v4 = vld [vmem:[%s178_s2 + $0x20] sm:$0xff]  ;;  %v25_v7 = vld [vmem:[%s178_s2 + $0x30] sm:$0xff] }
   0x4   :  { %47 = vmatpush.msra.mxu0 %v19_v1  ;;  %v18_v8 = vld [vmem:[%s180_s1] sm:$0xff]  ;;  %72 = vmatpush.msra.mxu1 %v25_v7 }
   0x5   :  { %117 = vmatmul.msk.f32.vlgmr.msra.gmra.mxu0 %vm28_vm0, %v17_v2  ;;  %94 = vmatpush.msra.mxu2 %v23_v4  ;;  %v26_v9 = vld [vmem:[%s181_s3] sm:$0xf] }
   0x6   :  { %118 = vmatmul.msk.f32.vlgmr.msra.gmra.mxu1 %vm53_vm1, %v18_v8  ;;  %v27_v10 = vperm.slane %v26_v9, 0  ;;  %v101_v15 = vperm.slane %v26_v9, 1  ;;  %v104_v19 = vperm.slane %v26_v9, 2  ;;  %v109_v23 = vperm.slane %v26_v9, 3 }
   0x7   :  { %95 = vmatpush.msra.mxu2 %v22_v5 }
   0x9   :  { %96 = vmatpush.msra.mxu2 %v21_v6 }
  0x82   :  { %v49_v11 = vpop.f32.mrf.mxu0 }
  0x83   :  { %v50_v12 = vadd.f32 %v49_v11, %v27_v10  ;;  %v74_v14 = vpop.f32.mrf.mxu1 }
  0x85   :  { %v52_v13 = vmax.f32 %v50_v12, 0.0 }
  0x87   :  { %119 = vmatmul.msk.f32.vlgmr.msra.gmra.mxu2 %vm77_vm2, %v52_v13 }
 0x10a   :  { %v98_v16 = vpop.f32.mrf.mxu2 }
 0x10b   :  { %v99_v17 = vadd.f32 %v98_v16, %v74_v14 }
 0x10d   :  { %v102_v18 = vadd.f32 %v101_v15, %v99_v17 }
 0x10f   :  { %v103_v20 = vmax.f32 %v102_v18, 0.0 }
 0x111   :  { %v105_v21 = vmul.f32 %v104_v19, %v103_v20 }
 0x113   :  { %v106_v22 = vsel %vm77_vm2, %v105_v21, 0.0 }
 0x114   :  { %107 = vadd.xlane.f32.xlu0 %v106_v22 }
 0x187   :  { %v108_v24 = vpop.xlane.xlu0 %107 }
 0x188   :  { %v110_v25 = vadd.f32 %v109_v23, %v108_v24 }
 0x18a   :  { %112 = vst.msk [vmem:[%s182_s4] sm:$0xff] %vm111_vm3, %v110_v25 }

</bundles_post_ra>
